<compile_context>
chip_gen: v7x
topology: tpu7x:2x2x1
jax: 0.10.0
libtpu: 0.0.40
codegen_flags: <defaults>
</compile_context>

<pallas_src>
from functools import partial

import jax
import jax.numpy as jnp
from jax.experimental import pallas as pl
from jax.experimental.pallas import tpu as pltpu

BN_EPS = 1e-5
MATMUL_DTYPE = jnp.bfloat16            # streaming dtype for activations / cols / deconv weight
DEFAULT_TILE_M = 1024                  # upper bound on rows per grid step
VMEM_LIMIT_BYTES = 32 * 1024 * 1024    # explicit scoped-VMEM limit (safe on v5e/v6e/v7x)
VMEM_BUDGET_BYTES = 20 * 1024 * 1024   # double-buffered working-set budget used for tile sizing


# --------------------------------------------------------------------------- #
# Pallas kernels
# --------------------------------------------------------------------------- #
def _deconv_matmul_stats_kernel(cols_ref, w_ref, y_ref, stats_ref):
    """One row tile of cols @ Wc (all 4 deconv output parities at once), with the
    BatchNorm sum / sum-of-squares accumulated while the tile is in VMEM."""
    y = jnp.dot(cols_ref[...], w_ref[...], preferred_element_type=jnp.float32)
    y_ref[...] = y

    @pl.when(pl.program_id(1) == 0)
    def _():
        stats_ref[...] = jnp.zeros_like(stats_ref)

    s = jnp.sum(y, axis=0, keepdims=True)
    ss = jnp.sum(y * y, axis=0, keepdims=True)
    stats_ref[...] += jnp.concatenate([s, ss], axis=0)[None]


def _bn_relu_head_sigmoid_kernel(y_ref, scale_ref, shift_ref, w_ref, b_ref, o_ref):
    """Last layer, on the parity-packed matmul output: folded BN + ReLU +
    block-diagonal 1x1-conv head + sigmoid."""
    h = jnp.maximum(y_ref[...] * scale_ref[...] + shift_ref[...], 0.0)
    z = jnp.dot(h, w_ref[...], preferred_element_type=jnp.float32) + b_ref[...]
    # TODO(synk): output is only 4*out_channels lanes wide (< 128) -> masked
    # partial stores; bytes are tiny so left as-is.
    o_ref[...] = 1.0 / (1.0 + jnp.exp(-z))


# --------------------------------------------------------------------------- #
# Small helpers
# --------------------------------------------------------------------------- #
def _round_up(x, m):
    return (x + m - 1) // m * m


def _cdiv(a, b):
    return -(-a // b)


def _budget_tile_rows(m, per_row_bytes, fixed_bytes, cap):
    """Largest row tile (multiple of 16) whose double-buffered footprint fits the
    VMEM budget, capped by `cap` and by the (16-rounded) problem size."""
    budget_tm = (VMEM_BUDGET_BYTES - fixed_bytes) // per_row_bytes
    budget_tm = max(16, (budget_tm // 16) * 16)
    cap = max(16, (cap // 16) * 16)
    return int(min(budget_tm, cap, _round_up(m, 16)))


# --------------------------------------------------------------------------- #
# Tiled pallas_call wrappers
# --------------------------------------------------------------------------- #
def _deconv_matmul_stats(cols, wmat, cap):
    """cols (M, 4*Cin) post-activation -> (ypre (MP, 4*Cout) f32, per-column
    [sum; sumsq] (2, 4*Cout) f32, tile rows).  MP is padded to the tile grid;
    zero pad rows contribute 0 to both sums."""
    m, k = cols.shape
    n4 = wmat.shape[1]
    per_row = 2 * (k * 2 + n4 * 4)        # bf16 cols + f32 out, double buffered
    fixed = 2 * k * n4 * 2                # bf16 weight, double buffered
    tm = _budget_tile_rows(m, per_row, fixed, cap)
    tiles = _cdiv(_round_up(m, 16), tm)
    nc = 2 if tiles >= 2 else 1           # leading "parallel" axis: megacore-friendly stats
    tiles = _round_up(tiles, nc)
    tpc = tiles // nc
    mp = tiles * tm
    if mp != m:
        cols = jnp.pad(cols, ((0, mp - m), (0, 0)))

    ypre, stats = pl.pallas_call(
        _deconv_matmul_stats_kernel,
        out_shape=(jax.ShapeDtypeStruct((mp, n4), jnp.float32),
                   jax.ShapeDtypeStruct((nc, 2, n4), jnp.float32)),
        grid=(nc, tpc),
        in_specs=[pl.BlockSpec((tm, k), lambda c, i: (c * tpc + i, 0)),
                  pl.BlockSpec((k, n4), lambda c, i: (0, 0))],
        out_specs=(pl.BlockSpec((tm, n4), lambda c, i: (c * tpc + i, 0)),
                   pl.BlockSpec((1, 2, n4), lambda c, i: (c, 0, 0))),
        compiler_params=pltpu.CompilerParams(
            dimension_semantics=("parallel", "arbitrary"),
            vmem_limit_bytes=VMEM_LIMIT_BYTES),
    )(cols.astype(MATMUL_DTYPE), wmat.astype(MATMUL_DTYPE))
    return ypre, jnp.sum(stats, axis=0), tm


def _head_on_parity_packed(ypre, scale4, shift4, w_bd, b4, tm):
    """BN + ReLU + block-diagonal 1x1-conv head + sigmoid on the parity-packed
    (MP, 4*NF) matmul output.  Reuses the matmul row tiling (MP % tm == 0)."""
    mp, c4 = ypre.shape
    oc4 = w_bd.shape[1]
    return pl.pallas_call(
        _bn_relu_head_sigmoid_kernel,
        out_shape=jax.ShapeDtypeStruct((mp, oc4), jnp.float32),
        grid=(mp // tm,),
        in_specs=[pl.BlockSpec((tm, c4), lambda i: (i, 0)),
                  pl.BlockSpec((1, c4), lambda i: (0, 0)),
                  pl.BlockSpec((1, c4), lambda i: (0, 0)),
                  pl.BlockSpec((c4, oc4), lambda i: (0, 0)),
                  pl.BlockSpec((1, oc4), lambda i: (0, 0))],
        out_specs=pl.BlockSpec((tm, oc4), lambda i: (i, 0)),
        compiler_params=pltpu.CompilerParams(
            dimension_semantics=("parallel",),
            vmem_limit_bytes=VMEM_LIMIT_BYTES),
    )(ypre, scale4.reshape(1, c4), shift4.reshape(1, c4), w_bd, b4.reshape(1, oc4))


# --------------------------------------------------------------------------- #
# JAX glue: parity-decomposed ConvTranspose2d(k=4, s=2, p=1)
# --------------------------------------------------------------------------- #
def _build_cols(x_nhwc):
    """2x2-window im2col of the 1-padded input: K = 4*Cin, no structural zeros.
    TODO(synk): could be fused into the matmul via manually-DMA'd (dy, dx)
    windows (memory_space=pl.ANY) to avoid materializing cols at all."""
    n, h, w, c = x_nhwc.shape
    xp = jnp.pad(x_nhwc, ((0, 0), (1, 1), (1, 1), (0, 0)))
    cols = jnp.concatenate(
        [xp[:, dy:dy + h + 1, dx:dx + w + 1, :] for dy in range(2) for dx in range(2)],
        axis=-1)                                               # (N, H+1, W+1, 4*Cin)
    return cols.reshape(n * (h + 1) * (w + 1), 4 * c), (n, h + 1, w + 1)


def _deconv_weight_matrix(w):
    """PyTorch ConvTranspose2d weight (Cin, Cout, 4, 4) -> (4*Cin, 4*Cout).

    Row order (dy, dx, cin) matches _build_cols; column order (gy, gx, cout)
    packs the 4 output parities so one matmul emits a lane-dense 4*Cout slab.
    Kernel tap for window offset d and output parity g is k = g + 2*(1 - d).
    """
    cin, cout = w.shape[0], w.shape[1]
    d = jnp.arange(2)
    k_idx = d[None, :] + 2 * (1 - d[:, None])                  # [delta, parity] -> tap
    wg = w[:, :, k_idx, :]                                     # (cin, cout, dy, gy, 4)
    wg = wg[:, :, :, :, k_idx]                                 # (cin, cout, dy, gy, dx, gx)
    wc = jnp.transpose(wg, (2, 4, 0, 3, 5, 1))                 # (dy, dx, cin, gy, gx, cout)
    return wc.reshape(4 * cin, 4 * cout)


def _depth_to_space_crop(ypre_valid, n, hp, wp, c):
    """(N*hp*wp, 4*C) parity-packed rows -> (N, 2*hp-2, 2*wp-2, C)."""
    y = ypre_valid.reshape(n, hp, wp, 2, 2, c)
    y = jnp.transpose(y, (0, 1, 3, 2, 4, 5)).reshape(n, 2 * hp, 2 * wp, c)
    return y[:, 1:2 * hp - 1, 1:2 * wp - 1, :]


def _border_sums(ypre_valid, n, hp, wp, nf):
    """Per-channel sum / sum-of-squares of the 1-pixel frame removed by the
    deconv crop, so the fused in-kernel stats can be corrected to post-crop."""
    y6 = ypre_valid.reshape(n, hp, wp, 2, 2, nf)
    top = y6[:, 0, :, 0, :, :]
    bot = y6[:, hp - 1, :, 1, :, :]
    left = y6[:, :, 0, :, 0, :]
    right = y6[:, :, wp - 1, :, 1, :]
    corners = jnp.stack([y6[:, 0, 0, 0, 0, :], y6[:, 0, wp - 1, 0, 1, :],
                         y6[:, hp - 1, 0, 1, 0, :], y6[:, hp - 1, wp - 1, 1, 1, :]])

    def _s(a):
        return jnp.sum(a.reshape(-1, nf), axis=0)

    def _ss(a):
        return jnp.sum(jnp.square(a).reshape(-1, nf), axis=0)

    fs = _s(top) + _s(bot) + _s(left) + _s(right) - _s(corners)
    fss = _ss(top) + _ss(bot) + _ss(left) + _ss(right) - _ss(corners)
    return fs, fss


# --------------------------------------------------------------------------- #
# Parameters + forward
# --------------------------------------------------------------------------- #
def init_params(key, in_channels, out_channels, num_filters, num_layers):
    params = {"deconv": [], "bn": [], "head": None}
    for i in range(num_layers):
        cin = in_channels if i == 0 else num_filters
        key, k1, k2 = jax.random.split(key, 3)
        fan_in = cin * 16
        w = jax.random.normal(k1, (cin, num_filters, 4, 4), jnp.float32) / jnp.sqrt(fan_in)
        b = jax.random.normal(k2, (num_filters,), jnp.float32) * 0.01   # cancelled by BN
        params["deconv"].append((w, b))
        # BatchNorm2d default init: weight=1, bias=0 (track_running_stats=False)
        params["bn"].append((jnp.ones((num_filters,), jnp.float32),
                             jnp.zeros((num_filters,), jnp.float32)))
    key, k1, k2 = jax.random.split(key, 3)
    w1 = jax.random.normal(k1, (out_channels, num_filters, 1, 1), jnp.float32) / jnp.sqrt(num_filters)
    b1 = jax.random.normal(k2, (out_channels,), jnp.float32) * 0.01
    params["head"] = (w1, b1)
    return params


@partial(jax.jit, static_argnames=("tile_m",))
def _forward_impl(x_nhwc, params, tile_m=DEFAULT_TILE_M):
    num_layers = len(params["deconv"])
    w1, b1 = params["head"]
    out_ch = w1.shape[0]
    wh = jnp.transpose(w1[:, :, 0, 0], (1, 0))                 # (NF, out_ch)
    w_bd = jnp.kron(jnp.eye(4, dtype=wh.dtype), wh)            # block-diag over the 4 parities
    b4 = jnp.tile(b1, 4)

    x = x_nhwc.astype(MATMUL_DTYPE)
    out = None
    for i, ((w, _b), (gamma, beta)) in enumerate(zip(params["deconv"], params["bn"])):
        # ConvTranspose2d bias _b is exactly cancelled by the BN mean subtraction
        # that immediately follows, so it is dropped from the hot path.
        nf = w.shape[1]
        cols, (n, hp, wp) = _build_cols(x)                     # bf16 cols stream
        wc = _deconv_weight_matrix(w)

        ypre, stats, tm = _deconv_matmul_stats(cols, wc, tile_m)
        m1 = n * hp * wp
        ypre_v = ypre[:m1]                                     # slice fuses into the consumers below

        # Post-crop batch statistics: fold the 4 parity groups, subtract the frame.
        tot_s = stats[0].reshape(4, nf).sum(axis=0)
        tot_ss = stats[1].reshape(4, nf).sum(axis=0)
        fs, fss = _border_sums(ypre_v, n, hp, wp, nf)
        count = n * (2 * hp - 2) * (2 * wp - 2)
        mean = (tot_s - fs) / count
        var = jnp.maximum((tot_ss - fss) / count - mean * mean, 0.0)
        scale = gamma * jax.lax.rsqrt(var + BN_EPS)
        shift = beta - mean * scale

        if i + 1 < num_layers:
            # Folded BN + ReLU rides along the depth-to-space/crop copy (pure
            # elementwise, fused by XLA); written in bf16 for the next layer.
            y = _depth_to_space_crop(ypre_v, n, hp, wp, nf)
            x = jnp.maximum(y * scale + shift, 0.0).astype(MATMUL_DTYPE)
        else:
            # Last layer: BN + ReLU + 1x1 head + sigmoid directly on the
            # parity-packed matmul output; only the tiny head output is
            # depth-to-spaced / cropped / transposed.
            zp = _head_on_parity_packed(ypre, jnp.tile(scale, 4), jnp.tile(shift, 4),
                                        w_bd, b4, tm)
            z = _depth_to_space_crop(zp[:m1], n, hp, wp, out_ch)
            out = jnp.transpose(z, (0, 3, 1, 2))               # NHWC -> NCHW
    return out


def deconv_head_forward(x, params, in_channels, period=1, counter=0,
                        tile_m=DEFAULT_TILE_M):
    """Forward pass of DeconvHead.  Returns (output_NCHW, should_fire)."""
    # TODO(synk): the firing counter (check_counters / last_output cache) is
    # Python-side module state, kept outside the kernels.
    should_fire = counter == 0
    if not should_fire:
        return None, should_fire
    assert len(params["deconv"]) >= 1, "DeconvHead needs at least one deconv layer"
    if x.ndim == 2:                                            # x.view(-1, in_channels, 1, 1)
        x = x.reshape(-1, in_channels, 1, 1)
    x = jnp.transpose(x, (0, 2, 3, 1)).astype(jnp.float32)     # NCHW -> NHWC
    out = _forward_impl(x, params, tile_m=tile_m)
    return out, should_fire


# --------------------------------------------------------------------------- #
# Pure-JAX float32 reference (for numerical parity checking)
# --------------------------------------------------------------------------- #
def _reference_forward(x_nchw, params):
    x = jnp.transpose(x_nchw, (0, 2, 3, 1)).astype(jnp.float32)
    for (w, b), (gamma, beta) in zip(params["deconv"], params["bn"]):
        # ConvTranspose2d(k=4, s=2, p=1) == dilated conv with flipped kernel.
        rhs = jnp.transpose(w[:, :, ::-1, ::-1], (2, 3, 0, 1))  # HWIO, spatially flipped
        y = jax.lax.conv_general_dilated(
            x, rhs, window_strides=(1, 1), padding=[(2, 2), (2, 2)],
            lhs_dilation=(2, 2), dimension_numbers=("NHWC", "HWIO", "NHWC"),
            precision=jax.lax.Precision.HIGHEST) + b
        mean = jnp.mean(y, axis=(0, 1, 2))
        var = jnp.var(y, axis=(0, 1, 2))
        x = jnp.maximum((y - mean) * jax.lax.rsqrt(var + BN_EPS) * gamma + beta, 0.0)
    w1, b1 = params["head"]
    wh = jnp.transpose(w1[:, :, 0, 0], (1, 0))
    z = jnp.einsum("nhwc,cd->nhwd", x, wh,
                   precision=jax.lax.Precision.HIGHEST) + b1
    return jnp.transpose(1.0 / (1.0 + jnp.exp(-z)), (0, 3, 1, 2))


# --------------------------------------------------------------------------- #
if __name__ == "__main__":
    key = jax.random.PRNGKey(0)
    N, C_IN, H, W = 2, 8, 2, 2
    OUT_CHANNELS, NUM_FILTERS, NUM_LAYERS = 2, 16, 3

    kx, kp = jax.random.split(key)
    x = jax.random.normal(kx, (N, C_IN, H, W), jnp.float32)
    params = init_params(kp, C_IN, OUT_CHANNELS, NUM_FILTERS, NUM_LAYERS)

    # tile_m=64 keeps tiles small enough that the multi-tile / two-partial-sum
    # fused-stats path is exercised even at these toy shapes.
    out, fired = deconv_head_forward(x, params, C_IN, period=1, tile_m=64)
    out = jax.block_until_ready(out)

    expected = (N, OUT_CHANNELS, H * 2 ** NUM_LAYERS, W * 2 ** NUM_LAYERS)
    assert fired is True
    assert out.shape == expected, (out.shape, expected)
    assert bool(jnp.all(jnp.isfinite(out)))
    assert bool(jnp.all((out >= 0.0) & (out <= 1.0)))          # sigmoid range

    # Numerical parity vs. pure-JAX f32 reference (bf16 streaming => loose tol).
    ref = jax.block_until_ready(_reference_forward(x, params))
    max_err = float(jnp.max(jnp.abs(out - ref)))
    assert max_err < 5e-2, f"numerical mismatch vs reference: max_err={max_err}"

    print("KERNEL_OK")
</pallas_src>

<mosaic_0001>
module attributes {stable_mosaic.version = 11 : i64} {
  func.func @_deconv_matmul_stats_kernel(%arg0: i32, %arg1: i32, %arg2: memref<32x32xbf16, #tpu.memory_space<vmem>>, %arg3: memref<32x64xbf16, #tpu.memory_space<vmem>>, %arg4: memref<32x64xf32, #tpu.memory_space<vmem>>, %arg5: memref<1x2x64xf32, #tpu.memory_space<vmem>>) attributes {dimension_semantics = [#tpu.dimension_semantics<parallel>, #tpu.dimension_semantics<arbitrary>], iteration_bounds = array<i64: 1, 1>, scalar_prefetch = 0 : i64, scratch_operands = 0 : i64, tpu.core_type = #tpu.core_type<tc>, window_params = [{transform_indices = @transform_0, window_bounds = array<i64: 32, 32>}, {pipeline_mode = #tpu.pipeline_mode<synchronous>, transform_indices = @transform_1, window_bounds = array<i64: 32, 64>}, {transform_indices = @transform_2, window_bounds = array<i64: 32, 64>}, {transform_indices = @transform_3, window_bounds = array<i64: 1, 2, 64>}]} {
    %c0 = arith.constant 0 : index
    %c0_0 = arith.constant 0 : index
    %0 = vector.load %arg2[%c0, %c0_0] : memref<32x32xbf16, #tpu.memory_space<vmem>>, vector<32x32xbf16>
    %c0_1 = arith.constant 0 : index
    %c0_2 = arith.constant 0 : index
    %1 = vector.load %arg3[%c0_1, %c0_2] : memref<32x64xbf16, #tpu.memory_space<vmem>>, vector<32x64xbf16>
    %cst = arith.constant dense<0.000000e+00> : vector<32x64xf32>
    %2 = tpu.matmul %0, %1, %cst {dimension_numbers = #tpu.dot_dimension_numbers<[1], [0], [0], [1], [0, 0, 1, 1], [], []>} : vector<32x32xbf16>, vector<32x64xbf16>, vector<32x64xf32> -> vector<32x64xf32>
    %c0_3 = arith.constant 0 : index
    %c0_4 = arith.constant 0 : index
    %3 = vector.load %arg4[%c0_3, %c0_4] : memref<32x64xf32, #tpu.memory_space<vmem>>, vector<32x64xf32>
    tpu.vector_store %arg4[%c0_3, %c0_4], %2 {strides = array<i32>} : memref<32x64xf32, #tpu.memory_space<vmem>>, vector<32x64xf32>,
    %c0_i32 = arith.constant 0 : i32
    %4 = arith.cmpi eq, %arg1, %c0_i32 : i32
    %5 = arith.extui %4 : i1 to i32
    %c0_i32_5 = arith.constant 0 : i32
    %6 = arith.cmpi ne, %5, %c0_i32_5 : i32
    scf.if %6 {
      %cst_14 = arith.constant 0.000000e+00 : f32
      %17 = vector.broadcast %cst_14 : f32 to vector<1x2x64xf32>
      %c0_15 = arith.constant 0 : index
      %c0_16 = arith.constant 0 : index
      %c0_17 = arith.constant 0 : index
      %18 = vector.load %arg5[%c0_15, %c0_16, %c0_17] : memref<1x2x64xf32, #tpu.memory_space<vmem>>, vector<1x2x64xf32>
      tpu.vector_store %arg5[%c0_15, %c0_16, %c0_17], %17 {strides = array<i32>} : memref<1x2x64xf32, #tpu.memory_space<vmem>>, vector<1x2x64xf32>,
    } else {
    }
    %cst_6 = arith.constant dense<0.000000e+00> : vector<64xf32>
    %7 = vector.multi_reduction <add>, %2, %cst_6 [0] : vector<32x64xf32> to vector<64xf32>
    %8 = vector.shape_cast %7 : vector<64xf32> to vector<1x64xf32>
    %9 = arith.mulf %2, %2 : vector<32x64xf32>
    %cst_7 = arith.constant dense<0.000000e+00> : vector<64xf32>
    %10 = vector.multi_reduction <add>, %9, %cst_7 [0] : vector<32x64xf32> to vector<64xf32>
    %11 = vector.shape_cast %10 : vector<64xf32> to vector<1x64xf32>
    %c0_8 = arith.constant 0 : index
    %c0_9 = arith.constant 0 : index
    %c0_10 = arith.constant 0 : index
    %12 = vector.load %arg5[%c0_8, %c0_9, %c0_10] : memref<1x2x64xf32, #tpu.memory_space<vmem>>, vector<1x2x64xf32>
    %13 = tpu.concatenate %8, %11 in 0 : vector<1x64xf32>, vector<1x64xf32> -> vector<2x64xf32>
    %14 = vector.shape_cast %13 : vector<2x64xf32> to vector<1x2x64xf32>
    %15 = arith.addf %12, %14 : vector<1x2x64xf32>
    %c0_11 = arith.constant 0 : index
    %c0_12 = arith.constant 0 : index
    %c0_13 = arith.constant 0 : index
    %16 = vector.load %arg5[%c0_11, %c0_12, %c0_13] : memref<1x2x64xf32, #tpu.memory_space<vmem>>, vector<1x2x64xf32>
    tpu.vector_store %arg5[%c0_11, %c0_12, %c0_13], %15 {strides = array<i32>} : memref<1x2x64xf32, #tpu.memory_space<vmem>>, vector<1x2x64xf32>,
    return
  }
  func.func @transform_0(%arg0: i32, %arg1: i32) -> (i32, i32) {
    %c1_i32 = arith.constant 1 : i32
    %0 = arith.muli %arg0, %c1_i32 : i32
    %1 = arith.addi %0, %arg1 : i32
    %c0_i32 = arith.constant 0 : i32
    %c0_i32_0 = arith.constant 0 : i32
    return %1, %c0_i32 : i32, i32
  }
  func.func @transform_1(%arg0: i32, %arg1: i32) -> (i32, i32) {
    %c0_i32 = arith.constant 0 : i32
    %c0_i32_0 = arith.constant 0 : i32
    %c0_i32_1 = arith.constant 0 : i32
    return %c0_i32, %c0_i32_0 : i32, i32
  }
  func.func @transform_2(%arg0: i32, %arg1: i32) -> (i32, i32) {
    %c1_i32 = arith.constant 1 : i32
    %0 = arith.muli %arg0, %c1_i32 : i32
    %1 = arith.addi %0, %arg1 : i32
    %c0_i32 = arith.constant 0 : i32
    %c0_i32_0 = arith.constant 0 : i32
    return %1, %c0_i32 : i32, i32
  }
  func.func @transform_3(%arg0: i32, %arg1: i32) -> (i32, i32, i32) {
    %c0_i32 = arith.constant 0 : i32
    %c0_i32_0 = arith.constant 0 : i32
    %c0_i32_1 = arith.constant 0 : i32
    return %arg0, %c0_i32, %c0_i32_0 : i32, i32, i32
  }
}

module attributes {stable_mosaic.version = 11 : i64} {
  func.func @_deconv_matmul_stats_kernel(%arg0: i32, %arg1: i32, %arg2: memref<64x64xbf16, #tpu.memory_space<vmem>>, %arg3: memref<64x64xbf16, #tpu.memory_space<vmem>>, %arg4: memref<64x64xf32, #tpu.memory_space<vmem>>, %arg5: memref<1x2x64xf32, #tpu.memory_space<vmem>>) attributes {dimension_semantics = [#tpu.dimension_semantics<parallel>, #tpu.dimension_semantics<arbitrary>], iteration_bounds = array<i64: 1, 1>, scalar_prefetch = 0 : i64, scratch_operands = 0 : i64, tpu.core_type = #tpu.core_type<tc>, window_params = [{transform_indices = @transform_0, window_bounds = array<i64: 64, 64>}, {pipeline_mode = #tpu.pipeline_mode<synchronous>, transform_indices = @transform_1, window_bounds = array<i64: 64, 64>}, {transform_indices = @transform_2, window_bounds = array<i64: 64, 64>}, {transform_indices = @transform_3, window_bounds = array<i64: 1, 2, 64>}]} {
    %c0 = arith.constant 0 : index
    %c0_0 = arith.constant 0 : index
    %0 = vector.load %arg2[%c0, %c0_0] : memref<64x64xbf16, #tpu.memory_space<vmem>>, vector<64x64xbf16>
    %c0_1 = arith.constant 0 : index
    %c0_2 = arith.constant 0 : index
    %1 = vector.load %arg3[%c0_1, %c0_2] : memref<64x64xbf16, #tpu.memory_space<vmem>>, vector<64x64xbf16>
    %cst = arith.constant dense<0.000000e+00> : vector<64x64xf32>
    %2 = tpu.matmul %0, %1, %cst {dimension_numbers = #tpu.dot_dimension_numbers<[1], [0], [0], [1], [0, 0, 1, 1], [], []>} : vector<64x64xbf16>, vector<64x64xbf16>, vector<64x64xf32> -> vector<64x64xf32>
    %c0_3 = arith.constant 0 : index
    %c0_4 = arith.constant 0 : index
    %3 = vector.load %arg4[%c0_3, %c0_4] : memref<64x64xf32, #tpu.memory_space<vmem>>, vector<64x64xf32>
    tpu.vector_store %arg4[%c0_3, %c0_4], %2 {strides = array<i32>} : memref<64x64xf32, #tpu.memory_space<vmem>>, vector<64x64xf32>,
    %c0_i32 = arith.constant 0 : i32
    %4 = arith.cmpi eq, %arg1, %c0_i32 : i32
    %5 = arith.extui %4 : i1 to i32
    %c0_i32_5 = arith.constant 0 : i32
    %6 = arith.cmpi ne, %5, %c0_i32_5 : i32
    scf.if %6 {
      %cst_14 = arith.constant 0.000000e+00 : f32
      %17 = vector.broadcast %cst_14 : f32 to vector<1x2x64xf32>
      %c0_15 = arith.constant 0 : index
      %c0_16 = arith.constant 0 : index
      %c0_17 = arith.constant 0 : index
      %18 = vector.load %arg5[%c0_15, %c0_16, %c0_17] : memref<1x2x64xf32, #tpu.memory_space<vmem>>, vector<1x2x64xf32>
      tpu.vector_store %arg5[%c0_15, %c0_16, %c0_17], %17 {strides = array<i32>} : memref<1x2x64xf32, #tpu.memory_space<vmem>>, vector<1x2x64xf32>,
    } else {
    }
    %cst_6 = arith.constant dense<0.000000e+00> : vector<64xf32>
    %7 = vector.multi_reduction <add>, %2, %cst_6 [0] : vector<64x64xf32> to vector<64xf32>
    %8 = vector.shape_cast %7 : vector<64xf32> to vector<1x64xf32>
    %9 = arith.mulf %2, %2 : vector<64x64xf32>
    %cst_7 = arith.constant dense<0.000000e+00> : vector<64xf32>
    %10 = vector.multi_reduction <add>, %9, %cst_7 [0] : vector<64x64xf32> to vector<64xf32>
    %11 = vector.shape_cast %10 : vector<64xf32> to vector<1x64xf32>
    %c0_8 = arith.constant 0 : index
    %c0_9 = arith.constant 0 : index
    %c0_10 = arith.constant 0 : index
    %12 = vector.load %arg5[%c0_8, %c0_9, %c0_10] : memref<1x2x64xf32, #tpu.memory_space<vmem>>, vector<1x2x64xf32>
    %13 = tpu.concatenate %8, %11 in 0 : vector<1x64xf32>, vector<1x64xf32> -> vector<2x64xf32>
    %14 = vector.shape_cast %13 : vector<2x64xf32> to vector<1x2x64xf32>
    %15 = arith.addf %12, %14 : vector<1x2x64xf32>
    %c0_11 = arith.constant 0 : index
    %c0_12 = arith.constant 0 : index
    %c0_13 = arith.constant 0 : index
    %16 = vector.load %arg5[%c0_11, %c0_12, %c0_13] : memref<1x2x64xf32, #tpu.memory_space<vmem>>, vector<1x2x64xf32>
    tpu.vector_store %arg5[%c0_11, %c0_12, %c0_13], %15 {strides = array<i32>} : memref<1x2x64xf32, #tpu.memory_space<vmem>>, vector<1x2x64xf32>,
    return
  }
  func.func @transform_0(%arg0: i32, %arg1: i32) -> (i32, i32) {
    %c1_i32 = arith.constant 1 : i32
    %0 = arith.muli %arg0, %c1_i32 : i32
    %1 = arith.addi %0, %arg1 : i32
    %c0_i32 = arith.constant 0 : i32
    %c0_i32_0 = arith.constant 0 : i32
    return %1, %c0_i32 : i32, i32
  }
  func.func @transform_1(%arg0: i32, %arg1: i32) -> (i32, i32) {
    %c0_i32 = arith.constant 0 : i32
    %c0_i32_0 = arith.constant 0 : i32
    %c0_i32_1 = arith.constant 0 : i32
    return %c0_i32, %c0_i32_0 : i32, i32
  }
  func.func @transform_2(%arg0: i32, %arg1: i32) -> (i32, i32) {
    %c1_i32 = arith.constant 1 : i32
    %0 = arith.muli %arg0, %c1_i32 : i32
    %1 = arith.addi %0, %arg1 : i32
    %c0_i32 = arith.constant 0 : i32
    %c0_i32_0 = arith.constant 0 : i32
    return %1, %c0_i32 : i32, i32
  }
  func.func @transform_3(%arg0: i32, %arg1: i32) -> (i32, i32, i32) {
    %c0_i32 = arith.constant 0 : i32
    %c0_i32_0 = arith.constant 0 : i32
    %c0_i32_1 = arith.constant 0 : i32
    return %arg0, %c0_i32, %c0_i32_0 : i32, i32, i32
  }
}

module attributes {stable_mosaic.version = 11 : i64} {
  func.func @_deconv_matmul_stats_kernel(%arg0: i32, %arg1: i32, %arg2: memref<64x64xbf16, #tpu.memory_space<vmem>>, %arg3: memref<64x64xbf16, #tpu.memory_space<vmem>>, %arg4: memref<64x64xf32, #tpu.memory_space<vmem>>, %arg5: memref<1x2x64xf32, #tpu.memory_space<vmem>>) attributes {dimension_semantics = [#tpu.dimension_semantics<parallel>, #tpu.dimension_semantics<arbitrary>], iteration_bounds = array<i64: 2, 2>, scalar_prefetch = 0 : i64, scratch_operands = 0 : i64, tpu.core_type = #tpu.core_type<tc>, window_params = [{transform_indices = @transform_0, window_bounds = array<i64: 64, 64>}, {pipeline_mode = #tpu.pipeline_mode<synchronous>, transform_indices = @transform_1, window_bounds = array<i64: 64, 64>}, {transform_indices = @transform_2, window_bounds = array<i64: 64, 64>}, {transform_indices = @transform_3, window_bounds = array<i64: 1, 2, 64>}]} {
    %c0 = arith.constant 0 : index
    %c0_0 = arith.constant 0 : index
    %0 = vector.load %arg2[%c0, %c0_0] : memref<64x64xbf16, #tpu.memory_space<vmem>>, vector<64x64xbf16>
    %c0_1 = arith.constant 0 : index
    %c0_2 = arith.constant 0 : index
    %1 = vector.load %arg3[%c0_1, %c0_2] : memref<64x64xbf16, #tpu.memory_space<vmem>>, vector<64x64xbf16>
    %cst = arith.constant dense<0.000000e+00> : vector<64x64xf32>
    %2 = tpu.matmul %0, %1, %cst {dimension_numbers = #tpu.dot_dimension_numbers<[1], [0], [0], [1], [0, 0, 1, 1], [], []>} : vector<64x64xbf16>, vector<64x64xbf16>, vector<64x64xf32> -> vector<64x64xf32>
    %c0_3 = arith.constant 0 : index
    %c0_4 = arith.constant 0 : index
    %3 = vector.load %arg4[%c0_3, %c0_4] : memref<64x64xf32, #tpu.memory_space<vmem>>, vector<64x64xf32>
    tpu.vector_store %arg4[%c0_3, %c0_4], %2 {strides = array<i32>} : memref<64x64xf32, #tpu.memory_space<vmem>>, vector<64x64xf32>,
    %c0_i32 = arith.constant 0 : i32
    %4 = arith.cmpi eq, %arg1, %c0_i32 : i32
    %5 = arith.extui %4 : i1 to i32
    %c0_i32_5 = arith.constant 0 : i32
    %6 = arith.cmpi ne, %5, %c0_i32_5 : i32
    scf.if %6 {
      %cst_14 = arith.constant 0.000000e+00 : f32
      %17 = vector.broadcast %cst_14 : f32 to vector<1x2x64xf32>
      %c0_15 = arith.constant 0 : index
      %c0_16 = arith.constant 0 : index
      %c0_17 = arith.constant 0 : index
      %18 = vector.load %arg5[%c0_15, %c0_16, %c0_17] : memref<1x2x64xf32, #tpu.memory_space<vmem>>, vector<1x2x64xf32>
      tpu.vector_store %arg5[%c0_15, %c0_16, %c0_17], %17 {strides = array<i32>} : memref<1x2x64xf32, #tpu.memory_space<vmem>>, vector<1x2x64xf32>,
    } else {
    }
    %cst_6 = arith.constant dense<0.000000e+00> : vector<64xf32>
    %7 = vector.multi_reduction <add>, %2, %cst_6 [0] : vector<64x64xf32> to vector<64xf32>
    %8 = vector.shape_cast %7 : vector<64xf32> to vector<1x64xf32>
    %9 = arith.mulf %2, %2 : vector<64x64xf32>
    %cst_7 = arith.constant dense<0.000000e+00> : vector<64xf32>
    %10 = vector.multi_reduction <add>, %9, %cst_7 [0] : vector<64x64xf32> to vector<64xf32>
    %11 = vector.shape_cast %10 : vector<64xf32> to vector<1x64xf32>
    %c0_8 = arith.constant 0 : index
    %c0_9 = arith.constant 0 : index
    %c0_10 = arith.constant 0 : index
    %12 = vector.load %arg5[%c0_8, %c0_9, %c0_10] : memref<1x2x64xf32, #tpu.memory_space<vmem>>, vector<1x2x64xf32>
    %13 = tpu.concatenate %8, %11 in 0 : vector<1x64xf32>, vector<1x64xf32> -> vector<2x64xf32>
    %14 = vector.shape_cast %13 : vector<2x64xf32> to vector<1x2x64xf32>
    %15 = arith.addf %12, %14 : vector<1x2x64xf32>
    %c0_11 = arith.constant 0 : index
    %c0_12 = arith.constant 0 : index
    %c0_13 = arith.constant 0 : index
    %16 = vector.load %arg5[%c0_11, %c0_12, %c0_13] : memref<1x2x64xf32, #tpu.memory_space<vmem>>, vector<1x2x64xf32>
    tpu.vector_store %arg5[%c0_11, %c0_12, %c0_13], %15 {strides = array<i32>} : memref<1x2x64xf32, #tpu.memory_space<vmem>>, vector<1x2x64xf32>,
    return
  }
  func.func @transform_0(%arg0: i32, %arg1: i32) -> (i32, i32) {
    %c2_i32 = arith.constant 2 : i32
    %0 = arith.muli %arg0, %c2_i32 : i32
    %1 = arith.addi %0, %arg1 : i32
    %c0_i32 = arith.constant 0 : i32
    %c0_i32_0 = arith.constant 0 : i32
    return %1, %c0_i32 : i32, i32
  }
  func.func @transform_1(%arg0: i32, %arg1: i32) -> (i32, i32) {
    %c0_i32 = arith.constant 0 : i32
    %c0_i32_0 = arith.constant 0 : i32
    %c0_i32_1 = arith.constant 0 : i32
    return %c0_i32, %c0_i32_0 : i32, i32
  }
  func.func @transform_2(%arg0: i32, %arg1: i32) -> (i32, i32) {
    %c2_i32 = arith.constant 2 : i32
    %0 = arith.muli %arg0, %c2_i32 : i32
    %1 = arith.addi %0, %arg1 : i32
    %c0_i32 = arith.constant 0 : i32
    %c0_i32_0 = arith.constant 0 : i32
    return %1, %c0_i32 : i32, i32
  }
  func.func @transform_3(%arg0: i32, %arg1: i32) -> (i32, i32, i32) {
    %c0_i32 = arith.constant 0 : i32
    %c0_i32_0 = arith.constant 0 : i32
    %c0_i32_1 = arith.constant 0 : i32
    return %arg0, %c0_i32, %c0_i32_0 : i32, i32, i32
  }
}

module attributes {stable_mosaic.version = 11 : i64} {
  func.func @_bn_relu_head_sigmoid_kernel(%arg0: i32, %arg1: memref<64x64xf32, #tpu.memory_space<vmem>>, %arg2: memref<1x64xf32, #tpu.memory_space<vmem>>, %arg3: memref<1x64xf32, #tpu.memory_space<vmem>>, %arg4: memref<64x8xf32, #tpu.memory_space<vmem>>, %arg5: memref<1x8xf32, #tpu.memory_space<vmem>>, %arg6: memref<64x8xf32, #tpu.memory_space<vmem>>) attributes {dimension_semantics = [#tpu.dimension_semantics<parallel>], iteration_bounds = array<i64: 4>, scalar_prefetch = 0 : i64, scratch_operands = 0 : i64, tpu.core_type = #tpu.core_type<tc>, window_params = [{transform_indices = @transform_0, window_bounds = array<i64: 64, 64>}, {pipeline_mode = #tpu.pipeline_mode<synchronous>, transform_indices = @transform_1, window_bounds = array<i64: 1, 64>}, {pipeline_mode = #tpu.pipeline_mode<synchronous>, transform_indices = @transform_2, window_bounds = array<i64: 1, 64>}, {pipeline_mode = #tpu.pipeline_mode<synchronous>, transform_indices = @transform_3, window_bounds = array<i64: 64, 8>}, {pipeline_mode = #tpu.pipeline_mode<synchronous>, transform_indices = @transform_4, window_bounds = array<i64: 1, 8>}, {transform_indices = @transform_5, window_bounds = array<i64: 64, 8>}]} {
    %c0 = arith.constant 0 : index
    %c0_0 = arith.constant 0 : index
    %0 = vector.load %arg1[%c0, %c0_0] : memref<64x64xf32, #tpu.memory_space<vmem>>, vector<64x64xf32>
    %c0_1 = arith.constant 0 : index
    %c0_2 = arith.constant 0 : index
    %1 = vector.load %arg2[%c0_1, %c0_2] : memref<1x64xf32, #tpu.memory_space<vmem>>, vector<1x64xf32>
    %2 = vector.broadcast %1 : vector<1x64xf32> to vector<64x64xf32>
    %3 = arith.mulf %0, %2 : vector<64x64xf32>
    %c0_3 = arith.constant 0 : index
    %c0_4 = arith.constant 0 : index
    %4 = vector.load %arg3[%c0_3, %c0_4] : memref<1x64xf32, #tpu.memory_space<vmem>>, vector<1x64xf32>
    %5 = vector.broadcast %4 : vector<1x64xf32> to vector<64x64xf32>
    %6 = arith.addf %3, %5 : vector<64x64xf32>
    %cst = arith.constant 0.000000e+00 : f32
    %7 = vector.broadcast %cst : f32 to vector<64x64xf32>
    %8 = arith.maximumf %6, %7 : vector<64x64xf32>
    %c0_5 = arith.constant 0 : index
    %c0_6 = arith.constant 0 : index
    %9 = vector.load %arg4[%c0_5, %c0_6] : memref<64x8xf32, #tpu.memory_space<vmem>>, vector<64x8xf32>
    %cst_7 = arith.constant dense<0.000000e+00> : vector<64x8xf32>
    %10 = tpu.matmul %8, %9, %cst_7 {dimension_numbers = #tpu.dot_dimension_numbers<[1], [0], [0], [1], [0, 0, 1, 1], [], []>} : vector<64x64xf32>, vector<64x8xf32>, vector<64x8xf32> -> vector<64x8xf32>
    %c0_8 = arith.constant 0 : index
    %c0_9 = arith.constant 0 : index
    %11 = vector.load %arg5[%c0_8, %c0_9] : memref<1x8xf32, #tpu.memory_space<vmem>>, vector<1x8xf32>
    %12 = vector.broadcast %11 : vector<1x8xf32> to vector<64x8xf32>
    %13 = arith.addf %10, %12 : vector<64x8xf32>
    %cst_10 = arith.constant 0.000000e+00 : f32
    %14 = vector.broadcast %cst_10 : f32 to vector<64x8xf32>
    %15 = arith.subf %14, %13 : vector<64x8xf32>
    %16 = math.exp %15 : vector<64x8xf32>
    %cst_11 = arith.constant 1.000000e+00 : f32
    %17 = vector.broadcast %cst_11 : f32 to vector<64x8xf32>
    %18 = arith.addf %17, %16 : vector<64x8xf32>
    %cst_12 = arith.constant 1.000000e+00 : f32
    %19 = vector.broadcast %cst_12 : f32 to vector<64x8xf32>
    %20 = arith.divf %19, %18 : vector<64x8xf32>
    %c0_13 = arith.constant 0 : index
    %c0_14 = arith.constant 0 : index
    %21 = vector.load %arg6[%c0_13, %c0_14] : memref<64x8xf32, #tpu.memory_space<vmem>>, vector<64x8xf32>
    tpu.vector_store %arg6[%c0_13, %c0_14], %20 {strides = array<i32>} : memref<64x8xf32, #tpu.memory_space<vmem>>, vector<64x8xf32>,
    return
  }
  func.func @transform_0(%arg0: i32) -> (i32, i32) {
    %c0_i32 = arith.constant 0 : i32
    %c0_i32_0 = arith.constant 0 : i32
    return %arg0, %c0_i32 : i32, i32
  }
  func.func @transform_1(%arg0: i32) -> (i32, i32) {
    %c0_i32 = arith.constant 0 : i32
    %c0_i32_0 = arith.constant 0 : i32
    %c0_i32_1 = arith.constant 0 : i32
    return %c0_i32, %c0_i32_0 : i32, i32
  }
  func.func @transform_2(%arg0: i32) -> (i32, i32) {
    %c0_i32 = arith.constant 0 : i32
    %c0_i32_0 = arith.constant 0 : i32
    %c0_i32_1 = arith.constant 0 : i32
    return %c0_i32, %c0_i32_0 : i32, i32
  }
  func.func @transform_3(%arg0: i32) -> (i32, i32) {
    %c0_i32 = arith.constant 0 : i32
    %c0_i32_0 = arith.constant 0 : i32
    %c0_i32_1 = arith.constant 0 : i32
    return %c0_i32, %c0_i32_0 : i32, i32
  }
  func.func @transform_4(%arg0: i32) -> (i32, i32) {
    %c0_i32 = arith.constant 0 : i32
    %c0_i32_0 = arith.constant 0 : i32
    %c0_i32_1 = arith.constant 0 : i32
    return %c0_i32, %c0_i32_0 : i32, i32
  }
  func.func @transform_5(%arg0: i32) -> (i32, i32) {
    %c0_i32 = arith.constant 0 : i32
    %c0_i32_0 = arith.constant 0 : i32
    return %arg0, %c0_i32 : i32, i32
  }
}

</mosaic_0001>

<bundles_post_ra>
// kernel: tile.29
= control target key start
LH: loop header
LB: loop body
LE: loop exit
PB: predicated region body
PF: predicated region fallthrough
CT: control target
= control target key end

     0   :  { %vm7_vm0 = vcmask 15360   ;;  %s37_s8 = smov 2   ;;  %s38_s9 = smov 4   ;;  %vm13_vm1 = vcmask 64560   ;;  %vm19_vm2 = vcmask 48160   ;;  %vm25_vm3 = vcmask 31760   ;;  %s55_s0 = inlined_call_operand.vmem [shape: f32[4,2], index: 0, kind: input, shape index: {}]   ;;  %s56_s1 = inlined_call_operand.vmem [shape: f32[1,8], index: 1, kind: output, shape index: {}]  }
   0x1   :  { %v4_v0 = vld [vmem:[%s55_s0] sm:$0xf]  ;;  %s36_s0 = smov 6  }
   0x2   :  { %5 = vst [vmem:[#allocation1] sm:$0xf] %v4_v0 }
   0x9   :  { %v10_v1 = vld [vmem:[#allocation1 + $0x3] sm:$0x1]   ;;  %v22_v2 = vld [vmem:[#allocation1 + $0x1] sm:$0x1]   ;;  %v6_v3 = vld [vmem:[#allocation1] sm:$0x1]  }
   0xa   :  { %11 = vrot.lane.b32.xlu0 %v10_v1, %s36_s0  ;;  %23 = vrot.lane.b32.xlu1 %v22_v2, %s37_s8  ;;  %v16_v4 = vld [vmem:[#allocation1 + $0x2] sm:$0x1]   ;;  %8 = vst.msk [vmem:[#allocation0] sm:$0x1] %vm7_vm0, %v6_v3  }
   0xe   :  { %17 = vrot.lane.b32.xlu0 %v16_v4, %s38_s9 }
  0x7c   :  { %v12_v5 = vpop.permute.xlu0 %11   ;;  %v24_v6 = vpop.permute.xlu1 %23  }
  0x7d   :  { %14 = vst.msk [vmem:[#allocation0] sm:$0x1] %vm13_vm1, %v12_v5  }
  0x80   :  { %v18_v7 = vpop.permute.xlu0 %17  }
  0x81   :  { %20 = vst.msk [vmem:[#allocation0] sm:$0x1] %vm19_vm2, %v18_v7  }
  0x82   :  { %26 = vst.msk [vmem:[#allocation0] sm:$0x1] %vm25_vm3, %v24_v6  }
  0x89   :  { %v30_v8 = vld [vmem:[#allocation0] sm:$0x1] }
  0x8a   :  { %32 = vst [vmem:[%s56_s1] sm:$0x1] %v30_v8 }

// kernel: tile.18
= control target key start
LH: loop header
LB: loop body
LE: loop exit
PB: predicated region body
PF: predicated region fallthrough
CT: control target
= control target key end

     0   :  { %s22_s0 = inlined_call_operand.vmem [shape: f32[2], index: 0, kind: input, shape index: {}]   ;;  %s23_s1 = inlined_call_operand.vmem [shape: f32[4,2], index: 1, kind: output, shape index: {}]  }
   0x1   :  { %v4_v0 = vld [vmem:[%s22_s0] ss:$0 sm:$0xff] }
   0x2   :  { %5 = vst [vmem:[%s23_s1] sm:$0xf] %v4_v0 }

// kernel: squeeze.44
= control target key start
LH: loop header
LB: loop body
LE: loop exit
PB: predicated region body
PF: predicated region fallthrough
CT: control target
= control target key end

     0   :  { %s37_s8 = smov 80   ;;  %vm7_vm0 = vcmask 130048   ;;  %s38_s9 = smov 96   ;;  %s55_s0 = inlined_call_operand.vmem [shape: f32[64], index: 0, kind: input, shape index: {}]   ;;  %s56_s1 = inlined_call_operand.vmem [shape: f32[4,16], index: 1, kind: output, shape index: {}]  }
   0x1   :  { %v4_v0 = vld [vmem:[%s55_s0] sm:$0x1]  ;;  %s36_s0 = smov 112  }
   0x2   :  { %5 = vst [vmem:[#allocation1] sm:$0x1] %v4_v0 }
   0x9   :  { %v9_v1 = vld [vmem:[#allocation1] sm:$0x1]  }
   0xa   :  { %v21_v2 = vld [vmem:[#allocation1] sm:$0x1]   ;;  %10 = vrot.lane.b32.xlu0 %v9_v1, %s36_s0 }
   0xb   :  { %22 = vrot.lane.b32.xlu1 %v21_v2, %s37_s8  ;;  %v6_v3 = vld [vmem:[#allocation1] sm:$0x1]  }
   0xc   :  { %v15_v4 = vld [vmem:[#allocation1] sm:$0x1]   ;;  %8 = vst.msk [vmem:[#allocation0] sm:$0x1] %vm7_vm0, %v6_v3  }
   0xe   :  { %16 = vrot.lane.b32.xlu0 %v15_v4, %s38_s9 }
  0x7c   :  { %v11_v5 = vpop.permute.xlu0 %10  }
  0x7d   :  { %v23_v6 = vpop.permute.xlu1 %22   ;;  %14 = vst.msk [vmem:[#allocation0 + $0x1] sm:$0x1] %vm7_vm0, %v11_v5  }
  0x7e   :  { %26 = vst.msk [vmem:[#allocation0 + $0x3] sm:$0x1] %vm7_vm0, %v23_v6  }
  0x80   :  { %v17_v7 = vpop.permute.xlu0 %16  }
  0x81   :  { %20 = vst.msk [vmem:[#allocation0 + $0x2] sm:$0x1] %vm7_vm0, %v17_v7  }
  0x88   :  { %v30_v8 = vld [vmem:[#allocation0] sm:$0xf] }
  0x89   :  { %32 = vst [vmem:[%s56_s1] sm:$0xf] %v30_v8 }

// kernel: _forward_impl.4
= control target key start
LH: loop header
LB: loop body
LE: loop exit
PB: predicated region body
PF: predicated region fallthrough
CT: control target
= control target key end

     0   :  { %vm80_vm0 = vcmask 261120   ;;  %vm145_vm1 = vcmask 517120   ;;  %v242_v4 = vmov 0.0   ;;  %vm136_vm2 = vcmask 523264   ;;  %s310_s1 = inlined_call_operand.vmem [shape: bf16[32,64], index: 1, kind: input, shape index: {}]   ;;  %s311_s0 = inlined_call_operand.vmem [shape: bf16[32,32], index: 0, kind: input, shape index: {}]   ;;  %s312_s3 = inlined_call_operand.vmem [shape: f32[1,2,64], index: 3, kind: output, shape index: {1}]   ;;  %s313_s2 = inlined_call_operand.vmem [shape: f32[32,64], index: 2, kind: output, shape index: {0}]  }
   0x1   :  { %v238_v0 = vld [vmem:[%s310_s1] sm:$0xff]   ;;  %v239_v1 = vld [vmem:[%s310_s1 + $0x8] sm:$0xff]   ;;  %146 = vst.msk [vmem:[%s312_s3] sm:$0x3] %vm145_vm1, %v242_v4  ;;  %vm178_vm3 = vcmask 1040384  }
   0x2   :  { %229 = vmatprep.subr.bf16.mxu0 %v238_v0  ;;  %v240_v2 = vld [vmem:[%s311_s0] sm:$0xff]   ;;  %v241_v3 = vld [vmem:[%s311_s0 + $0x8] sm:$0xff]  }
   0x3   :  { %230 = vmatpush3.bf16.msra.mxu0 %v238_v0  ;;  %233 = vmatprep.mubr.msk.bf16.mxu0 %vm80_vm0, %v240_v2 }
   0x4   :  { %231 = vmatprep.subr.bf16.mxu0 %v239_v1 }
   0x7   :  { %232 = vmatpush3.bf16.msra.mxu0 %v239_v1 }
   0x8   :  { %v177_v39 = vld [vmem:[%s312_s3] sm:$0x3] }
   0xa   :  { %234 = vmatmul.mubr.msk.bf16.vlgmr.msra.gmra.mrb[0].mxu0 %vm80_vm0, %v241_v3 }
  0xdd   :  { %v235_v5 = vpop.f32.mrb[0].mxu0 }
  0xde   :  { %139 = vst.msk [vmem:[%s313_s2 + $0x10] sm:$0xff] %vm136_vm2, %v235_v5  ;;  %v121_v6 = vpop.f32.mrb[1].mxu0  ;;  %v162_v10 = vmul.f32 %v235_v5, %v235_v5  ;;  %v150_v15 = vsel %vm136_vm2, %v235_v5, 0.0 }
  0xdf   :  { %137 = vst.msk [vmem:[%s313_s2] sm:$0xff] %vm136_vm2, %v121_v6  ;;  %v160_v7 = vmul.f32 %v121_v6, %v121_v6  ;;  %v236_v8 = vpop.f32.mrb[2].mxu0  ;;  %v147_v11 = vsel %vm136_vm2, %v121_v6, 0.0 }
  0xe0   :  { %140 = vst.msk [vmem:[%s313_s2 + $0x18] sm:$0xff] %vm136_vm2, %v236_v8  ;;  %v124_v9 = vpop.f32.mrb[3].mxu0  ;;  %v163_v17 = vmul.f32 %v236_v8, %v236_v8  ;;  %v167_v21 = vsel %vm136_vm2, %v162_v10, 0.0  ;;  %v152_v22 = vsel %vm136_vm2, %v236_v8, 0.0 }
  0xe1   :  { %138 = vst.msk [vmem:[%s313_s2 + $0x8] sm:$0xff] %vm136_vm2, %v124_v9  ;;  %v148_v12 = vsel %vm136_vm2, %v124_v9, 0.0  ;;  %v161_v13 = vmul.f32 %v124_v9, %v124_v9  ;;  %v164_v16 = vsel %vm136_vm2, %v160_v7, 0.0 }
  0xe2   :  { %v149_v14 = vadd.f32 %v148_v12, %v147_v11  ;;  %v169_v25 = vsel %vm136_vm2, %v163_v17, 0.0 }
  0xe3   :  { %v165_v18 = vsel %vm136_vm2, %v161_v13, 0.0 }
  0xe4   :  { %v151_v19 = vadd.f32 %v150_v15, %v149_v14  ;;  %v166_v20 = vadd.f32 %v165_v18, %v164_v16 }
  0xe6   :  { %v153_v23 = vadd.f32 %v152_v22, %v151_v19  ;;  %v168_v24 = vadd.f32 %v167_v21, %v166_v20 }
  0xe8   :  { %v154_v26 = vrot.slane %v153_v23, 4  ;;  %v170_v27 = vadd.f32 %v169_v25, %v168_v24 }
  0xea   :  { %v155_v28 = vadd.f32 %v154_v26, %v153_v23  ;;  %v171_v29 = vrot.slane %v170_v27, 4 }
  0xec   :  { %v156_v30 = vrot.slane %v155_v28, 2  ;;  %v172_v31 = vadd.f32 %v171_v29, %v170_v27 }
  0xee   :  { %v157_v32 = vadd.f32 %v156_v30, %v155_v28  ;;  %v173_v33 = vrot.slane %v172_v31, 2 }
  0xf0   :  { %v158_v34 = vrot.slane %v157_v32, 1  ;;  %v174_v35 = vadd.f32 %v173_v33, %v172_v31 }
  0xf2   :  { %v175_v36 = vrot.slane %v174_v35, 1  ;;  %v159_v37 = vadd.f32 %v158_v34, %v157_v32 }
  0xf4   :  { %v176_v38 = vadd.f32 %v175_v36, %v174_v35 }
  0xf6   :  { %v179_v40 = vsel %vm178_vm3, %v159_v37, %v176_v38 }
  0xf7   :  { %v180_v41 = vadd.f32 %v179_v40, %v177_v39 }
  0xf9   :  { %182 = vst.msk [vmem:[%s312_s3] sm:$0x3] %vm145_vm1, %v180_v41 }

// kernel: _forward_impl.5
= control target key start
LH: loop header
LB: loop body
LE: loop exit
PB: predicated region body
PF: predicated region fallthrough
CT: control target
= control target key end

     0   :  { %vm110_vm0 = vcmask 523264   ;;  %vm200_vm1 = vcmask 517120   ;;  %v347_v8 = vmov 0.0   ;;  %vm253_vm2 = vcmask 1040384   ;;  %s455_s1 = inlined_call_operand.vmem [shape: bf16[64,64], index: 1, kind: input, shape index: {}]   ;;  %s456_s0 = inlined_call_operand.vmem [shape: bf16[64,64], index: 0, kind: input, shape index: {}]   ;;  %s457_s3 = inlined_call_operand.vmem [shape: f32[1,2,64], index: 3, kind: output, shape index: {1}]   ;;  %s458_s2 = inlined_call_operand.vmem [shape: f32[64,64], index: 2, kind: output, shape index: {0}]  }
   0x1   :  { %v339_v0 = vld [vmem:[%s455_s1] sm:$0xff]   ;;  %v340_v1 = vld [vmem:[%s455_s1 + $0x8] sm:$0xff]   ;;  %v341_v2 = vld [vmem:[%s455_s1 + $0x10] sm:$0xff]   ;;  %201 = vst.msk [vmem:[%s457_s3] sm:$0x3] %vm200_vm1, %v347_v8 }
   0x2   :  { %314 = vmatprep.subr.bf16.mxu0 %v339_v0  ;;  %330 = vmatprep.subr.bf16.mxu1 %v339_v0  ;;  %v343_v3 = vld [vmem:[%s456_s0] sm:$0xff]   ;;  %v345_v4 = vld [vmem:[%s456_s0 + $0x10] sm:$0xff]   ;;  %v342_v5 = vld [vmem:[%s455_s1 + $0x18] sm:$0xff]  }
   0x3   :  { %315 = vmatpush3.bf16.msra.mxu0 %v339_v0  ;;  %334 = vmatpush3.bf16.msra.mxu1 %v339_v0  ;;  %v344_v6 = vld [vmem:[%s456_s0 + $0x8] sm:$0xff]   ;;  %v346_v7 = vld [vmem:[%s456_s0 + $0x18] sm:$0xff]  }
   0x4   :  { %316 = vmatprep.subr.bf16.mxu0 %v340_v1  ;;  %331 = vmatprep.subr.bf16.mxu1 %v340_v1 }
   0x5   :  { %322 = vmatprep.mubr.msk.bf16.mxu0 %vm110_vm0, %v343_v3  ;;  %326 = vmatprep.mubr.msk.bf16.mxu1 %vm110_vm0, %v345_v4 }
   0x7   :  { %317 = vmatpush3.bf16.msra.mxu0 %v340_v1  ;;  %335 = vmatpush3.bf16.msra.mxu1 %v340_v1 }
   0x8   :  { %318 = vmatprep.subr.bf16.mxu0 %v341_v2  ;;  %332 = vmatprep.subr.bf16.mxu1 %v341_v2  ;;  %v252_v3 = vld [vmem:[%s457_s3] sm:$0x3] }
   0xb   :  { %319 = vmatpush3.bf16.msra.mxu0 %v341_v2  ;;  %336 = vmatpush3.bf16.msra.mxu1 %v341_v2 }
   0xc   :  { %320 = vmatprep.subr.bf16.mxu0 %v342_v5  ;;  %333 = vmatprep.subr.bf16.mxu1 %v342_v5 }
   0xf   :  { %321 = vmatpush3.bf16.msra.mxu0 %v342_v5  ;;  %337 = vmatpush3.bf16.msra.mxu1 %v342_v5 }
  0x12   :  { %323 = vmatmul.mubr.msk.bf16.vlgmr.msra.gmra.mrb[0].mxu0 %vm110_vm0, %v344_v6  ;;  %327 = vmatmul.mubr.msk.bf16.vlgmr.msra.gmra.mrb[0].mxu1 %vm110_vm0, %v346_v7 }
  0xe5   :  { %v324_v9 = vpop.f32.mrb[0].mxu0  ;;  %v328_v10 = vpop.f32.mrb[0].mxu1 }
  0xe6   :  { %190 = vst.msk [vmem:[%s458_s2 + $0x10] sm:$0xff] %vm110_vm0, %v324_v9  ;;  %v157_v11 = vpop.f32.mrb[1].mxu0  ;;  %194 = vst.msk [vmem:[%s458_s2 + $0x30] sm:$0xff] %vm110_vm0, %v328_v10  ;;  %v173_v12 = vpop.f32.mrb[1].mxu1  ;;  %v225_v18 = vmul.f32 %v324_v9, %v324_v9  ;;  %v205_v22 = vsel %vm110_vm0, %v324_v9, 0.0  ;;  %v229_v40 = vmul.f32 %v328_v10, %v328_v10  ;;  %v213_v44 = vsel %vm110_vm0, %v328_v10, 0.0 }
  0xe7   :  { %188 = vst.msk [vmem:[%s458_s2] sm:$0xff] %vm110_vm0, %v157_v11  ;;  %v223_v13 = vmul.f32 %v157_v11, %v157_v11  ;;  %v325_v14 = vpop.f32.mrb[2].mxu0  ;;  %192 = vst.msk [vmem:[%s458_s2 + $0x20] sm:$0xff] %vm110_vm0, %v173_v12  ;;  %v329_v15 = vpop.f32.mrb[2].mxu1  ;;  %v202_v19 = vsel %vm110_vm0, %v157_v11, 0.0  ;;  %v227_v27 = vmul.f32 %v173_v12, %v173_v12  ;;  %v209_v32 = vsel %vm110_vm0, %v173_v12, 0.0 }
  0xe8   :  { %191 = vst.msk [vmem:[%s458_s2 + $0x18] sm:$0xff] %vm110_vm0, %v325_v14  ;;  %v160_v16 = vpop.f32.mrb[3].mxu0  ;;  %195 = vst.msk [vmem:[%s458_s2 + $0x38] sm:$0xff] %vm110_vm0, %v329_v15  ;;  %v176_v17 = vpop.f32.mrb[3].mxu1  ;;  %v226_v25 = vmul.f32 %v325_v14, %v325_v14  ;;  %v234_v30 = vsel %vm110_vm0, %v225_v18, 0.0  ;;  %v207_v31 = vsel %vm110_vm0, %v325_v14, 0.0  ;;  %v230_v45 = vmul.f32 %v329_v15, %v329_v15 }
  0xe9   :  { %189 = vst.msk [vmem:[%s458_s2 + $0x8] sm:$0xff] %vm110_vm0, %v160_v16  ;;  %v203_v20 = vsel %vm110_vm0, %v160_v16, 0.0  ;;  %v224_v21 = vmul.f32 %v160_v16, %v160_v16  ;;  %193 = vst.msk [vmem:[%s458_s2 + $0x28] sm:$0xff] %vm110_vm0, %v176_v17  ;;  %v231_v24 = vsel %vm110_vm0, %v223_v13, 0.0  ;;  %v238_v36 = vsel %vm110_vm0, %v227_v27, 0.0 }
  0xea   :  { %v204_v23 = vadd.f32 %v203_v20, %v202_v19  ;;  %v236_v35 = vsel %vm110_vm0, %v226_v25, 0.0  ;;  %v228_v37 = vmul.f32 %v176_v17, %v176_v17  ;;  %v211_v41 = vsel %vm110_vm0, %v176_v17, 0.0 }
  0xeb   :  { %v232_v26 = vsel %vm110_vm0, %v224_v21, 0.0  ;;  %v242_v49 = vsel %vm110_vm0, %v229_v40, 0.0  ;;  %v215_v50 = vsel %vm110_vm0, %v329_v15, 0.0  ;;  %v244_v53 = vsel %vm110_vm0, %v230_v45, 0.0 }
  0xec   :  { %v206_v28 = vadd.f32 %v205_v22, %v204_v23  ;;  %v233_v29 = vadd.f32 %v232_v26, %v231_v24  ;;  %v240_v46 = vsel %vm110_vm0, %v228_v37, 0.0 }
  0xee   :  { %v235_v33 = vadd.f32 %v234_v30, %v233_v29  ;;  %v208_v34 = vadd.f32 %v207_v31, %v206_v28 }
  0xf0   :  { %v210_v38 = vadd.f32 %v209_v32, %v208_v34  ;;  %v237_v39 = vadd.f32 %v236_v35, %v235_v33 }
  0xf2   :  { %v239_v42 = vadd.f32 %v238_v36, %v237_v39  ;;  %v212_v43 = vadd.f32 %v211_v41, %v210_v38 }
  0xf4   :  { %v214_v47 = vadd.f32 %v213_v44, %v212_v43  ;;  %v241_v48 = vadd.f32 %v240_v46, %v239_v42 }
  0xf6   :  { %v216_v51 = vadd.f32 %v215_v50, %v214_v47  ;;  %v243_v52 = vadd.f32 %v242_v49, %v241_v48 }
  0xf8   :  { %v217_v54 = vrot.slane %v216_v51, 4  ;;  %v245_v55 = vadd.f32 %v244_v53, %v243_v52 }
  0xfa   :  { %v218_v56 = vadd.f32 %v217_v54, %v216_v51  ;;  %v246_v57 = vrot.slane %v245_v55, 4 }
  0xfc   :  { %v219_v58 = vrot.slane %v218_v56, 2  ;;  %v247_v59 = vadd.f32 %v246_v57, %v245_v55 }
  0xfe   :  { %v220_v60 = vadd.f32 %v219_v58, %v218_v56  ;;  %v248_v61 = vrot.slane %v247_v59, 2 }
 0x100   :  { %v221_v62 = vrot.slane %v220_v60, 1  ;;  %v249_v63 = vadd.f32 %v248_v61, %v247_v59 }
 0x102   :  { %v250_v0 = vrot.slane %v249_v63, 1  ;;  %v222_v1 = vadd.f32 %v221_v62, %v220_v60 }
 0x104   :  { %v251_v2 = vadd.f32 %v250_v0, %v249_v63 }
 0x106   :  { %v254_v4 = vsel %vm253_vm2, %v222_v1, %v251_v2 }
 0x107   :  { %v255_v5 = vadd.f32 %v254_v4, %v252_v3 }
 0x109   :  { %257 = vst.msk [vmem:[%s457_s3] sm:$0x3] %vm200_vm1, %v255_v5 }

// kernel: _forward_impl.6
= control target key start
LH: loop header
LB: loop body
LE: loop exit
PB: predicated region body
PF: predicated region fallthrough
CT: control target
= control target key end

     0   :  { %s708_s12 = smov 0   ;;  %s710_s13 = smov 0   ;;  %s811_s0 = inlined_call_operand.vmem [shape: bf16[256,64], index: 0, kind: input, shape index: {}]   ;;  %s812_s1 = inlined_call_operand.vmem [shape: bf16[64,64], index: 1, kind: input, shape index: {}]   ;;  %s813_s2 = inlined_call_operand.vmem [shape: f32[256,64], index: 2, kind: output, shape index: {0}]   ;;  %s814_s3 = inlined_call_operand.vmem [shape: f32[2,2,64], index: 3, kind: output, shape index: {1}]  }
   0x1   :  { %s712_s14 = smov 0   ;;  %s714_s15 = smov 0  }
   0x2   :  { %s716_s16 = smov 0  }
   0x3 LB: > { %s23_s17 = sadd.s32 1, %s677_s14  ;;  %s26_s18 = sadd.s32 1, %s681_s15  ;;  %s685_s16 = sphi %s716_s16, %s14_s16   ;;  %s681_s15 = sphi %s714_s15, %s818_s15   ;;  %s677_s14 = sphi %s712_s14, %s817_s14   ;;  %s673_s13 = sphi %s710_s13, %s816_s13   ;;  %s669_s12 = sphi %s708_s12, %s815_s12  }
   0x4   : > { %p24_p0 = scmp.ge.s32.totalorder %s23_s17, 2  ;;  %p543_p1 = scmp.ge.s32.totalorder %s685_s16, 1 }
   0x5   : > { %p165_p2 = scmp.lt.s32.totalorder %s685_s16, 5 }
   0x6   : > { %s820_s17 = smov (%p24_p0, %s23_s17), 0  ;;  %s822_s18 = smov (!%p24_p0, %s26_s18), %s681_s15 }
   0x7   : > { %p166_p3 = pnand %p543_p1, %p165_p2  ;;  %p28_p4 = scmp.ge.s32.totalorder %s822_s18, 2 }
   0x8   : > { %p217_p5 = scmp.lt.s32.totalorder (!%p166_p3), %s673_s13, 1  ;;  %v639_v0 = vld [vmem:[%s812_s1] sm:$0xff] (!%p166_p3)   ;;  %v640_v1 = vld [vmem:[%s812_s1 + $0x8] sm:$0xff] (!%p166_p3)   ;;  %s544_s23 = sshll.u32 (!%p166_p3), %s673_s13, 1  ;;  %v641_v2 = vld [vmem:[%s812_s1 + $0x10] sm:$0xff] (!%p166_p3)   ;;  %vm282_vm0 = vcmask (!%p166_p3), 523264  }
   0x9   : > { %s824_s18 = smov (%p28_p4, %s822_s18), 0  ;;  %169 = sbr.rel (%p166_p3) target bundleno = 276 (0x114), region = 28 }
   0xa   : > { %574 = vmatprep.subr.bf16.mxu0 (!%p166_p3), %v639_v0  ;;  %590 = vmatprep.subr.bf16.mxu1 (!%p166_p3), %v639_v0  ;;  %s198_s24 = sadd.s32 (!%p166_p3), %s669_s12, %s544_s23  ;;  %v642_v3 = vld [vmem:[%s812_s1 + $0x18] sm:$0xff] (!%p166_p3)   ;;  %p563_p7 = scmp.ne.s32.totalorder (!%p166_p3), %s669_s12, 0 }
   0xb   : > { %575 = vmatpush3.bf16.msra.mxu0 (!%p166_p3), %v639_v0  ;;  %594 = vmatpush3.bf16.msra.mxu1 (!%p166_p3), %v639_v0  ;;  %s545_s28 = sshll.u32 (!%p166_p3), %s198_s24, 3 }
   0xc   : > { %576 = vmatprep.subr.bf16.mxu0 (!%p166_p3), %v640_v1  ;;  %591 = vmatprep.subr.bf16.mxu1 (!%p166_p3), %v640_v1  ;;  %p200_p6 = scmp.lt.s32.totalorder (!%p166_p3), %s545_s28, 31 }
   0xf   : > { %577 = vmatpush3.bf16.msra.mxu0 (!%p166_p3), %v640_v1  ;;  %595 = vmatpush3.bf16.msra.mxu1 (!%p166_p3), %v640_v1 }
  0x10   : > { %s826_s13 = smov (!%p217_p5, %s673_s13), 1  ;;  %s828_s28 = smov (!%p200_p6, %s545_s28), 31  ;;  %578 = vmatprep.subr.bf16.mxu0 %v641_v2  ;;  %592 = vmatprep.subr.bf16.mxu1 %v641_v2 }
  0x11   : > { %s550_s25 = sshll.u32 %s826_s13, 1  ;;  %s546_s7 = sshll.u32 %s828_s28, 2  ;;  %vm372_vm1 = vcmask (!%p563_p7), 517120   ;;  %v687_v16 = vmov (!%p563_p7), 0.0  }
  0x12   : > { %s753_s4 = scalar_lea.vmem %s814_s3, %s550_s25  ;;  %s203_s10 = scalar_lea.vmem %s811_s0, %s546_s7 }
  0x13   : > { %579 = vmatpush3.bf16.msra.mxu0 %v641_v2  ;;  %596 = vmatpush3.bf16.msra.mxu1 %v641_v2  ;;  %v643_v4 = vld [vmem:[%s203_s10] sm:$0xff]   ;;  %v644_v5 = vld [vmem:[%s203_s10 + $0x10] sm:$0xff]   ;;  %v645_v6 = vld [vmem:[%s203_s10 + $0x8] sm:$0xff]   ;;  %s549_s11 = sshll.u32 %s828_s28, 3  ;;  %373 = vst.msk [vmem:[%s753_s4] sm:$0x3] (!%p563_p7), %vm372_vm1, %v687_v16 }
  0x14   : > { %580 = vmatprep.subr.bf16.mxu0 %v642_v3  ;;  %593 = vmatprep.subr.bf16.mxu1 %v642_v3  ;;  %v646_v7 = vld [vmem:[%s203_s10 + $0x18] sm:$0xff]   ;;  %s213_s20 = scalar_lea.vmem %s813_s2, %s549_s11 }
  0x15   : > { %582 = vmatprep.mubr.msk.bf16.mxu0 %vm282_vm0, %v643_v4  ;;  %586 = vmatprep.mubr.msk.bf16.mxu1 %vm282_vm0, %v644_v5 }
  0x17   : > { %581 = vmatpush3.bf16.msra.mxu0 %v642_v3  ;;  %597 = vmatpush3.bf16.msra.mxu1 %v642_v3 }
  0x1a   : > { %583 = vmatmul.mubr.msk.bf16.vlgmr.msra.gmra.mrb[0].mxu0 %vm282_vm0, %v645_v6  ;;  %587 = vmatmul.mubr.msk.bf16.vlgmr.msra.gmra.mrb[0].mxu1 %vm282_vm0, %v646_v7 }
  0xeb   : > { %371 = sbr.rel (%p563_p7) target bundleno = 242 (0xf2), region = 32 }
  0xed   : > { %v584_v8 = vpop.f32.mrb[0].mxu0  ;;  %v588_v9 = vpop.f32.mrb[0].mxu1 }
  0xee   : > { %362 = vst.msk [vmem:[%s213_s20 + $0x10] sm:$0xff] %vm282_vm0, %v584_v8  ;;  %366 = vst.msk [vmem:[%s213_s20 + $0x30] sm:$0xff] %vm282_vm0, %v588_v9  ;;  %v329_v10 = vpop.f32.mrb[1].mxu0  ;;  %v345_v11 = vpop.f32.mrb[1].mxu1 }
  0xef   : > { %360 = vst.msk [vmem:[%s213_s20] sm:$0xff] %vm282_vm0, %v329_v10  ;;  %364 = vst.msk [vmem:[%s213_s20 + $0x20] sm:$0xff] %vm282_vm0, %v345_v11  ;;  %v585_v12 = vpop.f32.mrb[2].mxu0  ;;  %v589_v13 = vpop.f32.mrb[2].mxu1 }
  0xf0   : > { %363 = vst.msk [vmem:[%s213_s20 + $0x18] sm:$0xff] %vm282_vm0, %v585_v12  ;;  %367 = vst.msk [vmem:[%s213_s20 + $0x38] sm:$0xff] %vm282_vm0, %v589_v13  ;;  %v332_v14 = vpop.f32.mrb[3].mxu0  ;;  %v348_v15 = vpop.f32.mrb[3].mxu1 }
  0xf1   : > { %361 = vst.msk [vmem:[%s213_s20 + $0x8] sm:$0xff] %vm282_vm0, %v332_v14  ;;  %365 = vst.msk [vmem:[%s213_s20 + $0x28] sm:$0xff] %vm282_vm0, %v348_v15 }
  0xf2 PF: > { %v374_v17 = vsel %vm282_vm0, %v329_v10, 0.0  ;;  %v375_v18 = vsel %vm282_vm0, %v332_v14, 0.0  ;;  %v377_v19 = vsel %vm282_vm0, %v584_v8, 0.0  ;;  %v379_v21 = vsel %vm282_vm0, %v585_v12, 0.0  ;;  %v424_v3 = vld [vmem:[%s753_s4] sm:$0x3] }
  0xf3   : > { %v376_v20 = vadd.f32 %v375_v18, %v374_v17  ;;  %v395_v22 = vmul.f32 %v329_v10, %v329_v10  ;;  %v396_v23 = vmul.f32 %v332_v14, %v332_v14  ;;  %v397_v24 = vmul.f32 %v584_v8, %v584_v8 }
  0xf4   : > { %v398_v26 = vmul.f32 %v585_v12, %v585_v12  ;;  %v381_v27 = vsel %vm282_vm0, %v345_v11, 0.0  ;;  %v399_v28 = vmul.f32 %v345_v11, %v345_v11  ;;  %v383_v34 = vsel %vm282_vm0, %v348_v15, 0.0 }
  0xf5   : > { %v378_v25 = vadd.f32 %v377_v19, %v376_v20  ;;  %v403_v29 = vsel %vm282_vm0, %v395_v22, 0.0  ;;  %v404_v30 = vsel %vm282_vm0, %v396_v23, 0.0  ;;  %v406_v33 = vsel %vm282_vm0, %v397_v24, 0.0 }
  0xf6   : > { %v405_v32 = vadd.f32 %v404_v30, %v403_v29  ;;  %v400_v35 = vmul.f32 %v348_v15, %v348_v15  ;;  %v408_v36 = vsel %vm282_vm0, %v398_v26, 0.0  ;;  %v385_v39 = vsel %vm282_vm0, %v588_v9, 0.0 }
  0xf7   : > { %v380_v31 = vadd.f32 %v379_v21, %v378_v25  ;;  %v401_v40 = vmul.f32 %v588_v9, %v588_v9  ;;  %v410_v41 = vsel %vm282_vm0, %v399_v28, 0.0  ;;  %v387_v44 = vsel %vm282_vm0, %v589_v13, 0.0 }
  0xf8   : > { %v407_v38 = vadd.f32 %v406_v33, %v405_v32  ;;  %v402_v45 = vmul.f32 %v589_v13, %v589_v13  ;;  %v412_v46 = vsel %vm282_vm0, %v400_v35, 0.0  ;;  %vm425_vm2 = vcmask 1040384  }
  0xf9   : > { %v382_v37 = vadd.f32 %v381_v27, %v380_v31  ;;  %v414_v49 = vsel %vm282_vm0, %v401_v40, 0.0  ;;  %vm428_vm3 = vcmask 517120  }
  0xfa   : > { %v409_v43 = vadd.f32 %v408_v36, %v407_v38  ;;  %v416_v52 = vsel %vm282_vm0, %v402_v45, 0.0 }
  0xfb   : > { %v384_v42 = vadd.f32 %v383_v34, %v382_v37 }
  0xfc   : > { %v411_v48 = vadd.f32 %v410_v41, %v409_v43 }
  0xfd   : > { %v386_v47 = vadd.f32 %v385_v39, %v384_v42 }
  0xfe   : > { %v413_v51 = vadd.f32 %v412_v46, %v411_v48 }
  0xff   : > { %v388_v50 = vadd.f32 %v387_v44, %v386_v47 }
 0x100   : > { %v415_v54 = vadd.f32 %v414_v49, %v413_v51 }
 0x101   : > { %v389_v53 = vrot.slane %v388_v50, 4 }
 0x102   : > { %v417_v56 = vadd.f32 %v416_v52, %v415_v54 }
 0x103   : > { %v390_v55 = vadd.f32 %v389_v53, %v388_v50 }
 0x104   : > { %v418_v58 = vrot.slane %v417_v56, 4 }
 0x105   : > { %v391_v57 = vrot.slane %v390_v55, 2 }
 0x106   : > { %v419_v60 = vadd.f32 %v418_v58, %v417_v56 }
 0x107   : > { %v392_v59 = vadd.f32 %v391_v57, %v390_v55 }
 0x108   : > { %v420_v62 = vrot.slane %v419_v60, 2 }
 0x109   : > { %v393_v61 = vrot.slane %v392_v59, 1 }
 0x10a   : > { %v421_v63 = vadd.f32 %v420_v62, %v419_v60 }
 0x10b   : > { %v394_v0 = vadd.f32 %v393_v61, %v392_v59 }
 0x10c   : > { %v422_v1 = vrot.slane %v421_v63, 1 }
 0x10e   : > { %v423_v2 = vadd.f32 %v422_v1, %v421_v63 }
 0x110   : > { %v426_v4 = vsel %vm425_vm2, %v394_v0, %v423_v2 }
 0x111   : > { %v427_v5 = vadd.f32 %v426_v4, %v424_v3 }
 0x113   : > { %429 = vst.msk [vmem:[%s753_s4] sm:$0x3] %vm428_vm3, %v427_v5 }
 0x114 PF: > { %s14_s16 = sadd.s32 1, %s685_s16   ;;  %s815_s12 = smov %s677_s14 }
 0x115   : > { %p11_p8 = scmp.ge.s32.totalorder %s14_s16, 6   ;;  %s816_s13 = smov %s681_s15 }
 0x116   : > { %s817_s14 = smov %s820_s17  ;;  %s818_s15 = smov %s824_s18 }
 0x117   :  { %13 = sbr.rel (!%p11_p8) target bundleno = 3 (0x3), region = 74 }

// kernel: tile.26
= control target key start
LH: loop header
LB: loop body
LE: loop exit
PB: predicated region body
PF: predicated region fallthrough
CT: control target
= control target key end

     0   :  { %s22_s0 = inlined_call_operand.vmem [shape: f32[16], index: 0, kind: input, shape index: {}]   ;;  %s23_s1 = inlined_call_operand.vmem [shape: f32[4,16], index: 1, kind: output, shape index: {}]  }
   0x1   :  { %v4_v0 = vld [vmem:[%s22_s0] ss:$0 sm:$0xff] }
   0x2   :  { %5 = vst [vmem:[%s23_s1] sm:$0xf] %v4_v0 }

// kernel: tile.28
= control target key start
LH: loop header
LB: loop body
LE: loop exit
PB: predicated region body
PF: predicated region fallthrough
CT: control target
= control target key end

     0   :  { %vm7_vm0 = vcmask 130048   ;;  %s37_s8 = smov 16   ;;  %s38_s9 = smov 32   ;;  %vm13_vm1 = vcmask 523648   ;;  %vm19_vm2 = vcmask 392448   ;;  %vm25_vm3 = vcmask 261248   ;;  %s55_s0 = inlined_call_operand.vmem [shape: f32[4,16], index: 0, kind: input, shape index: {}]   ;;  %s56_s1 = inlined_call_operand.vmem [shape: f32[1,64], index: 1, kind: output, shape index: {}]  }
   0x1   :  { %v4_v0 = vld [vmem:[%s55_s0] sm:$0xf]  ;;  %s36_s0 = smov 48  }
   0x2   :  { %5 = vst [vmem:[#allocation1] sm:$0xf] %v4_v0 }
   0x9   :  { %v10_v1 = vld [vmem:[#allocation1 + $0x3] sm:$0x1]   ;;  %v22_v2 = vld [vmem:[#allocation1 + $0x1] sm:$0x1]   ;;  %v6_v3 = vld [vmem:[#allocation1] sm:$0x1]  }
   0xa   :  { %11 = vrot.lane.b32.xlu0 %v10_v1, %s36_s0  ;;  %23 = vrot.lane.b32.xlu1 %v22_v2, %s37_s8  ;;  %v16_v4 = vld [vmem:[#allocation1 + $0x2] sm:$0x1]   ;;  %8 = vst.msk [vmem:[#allocation0] sm:$0x1] %vm7_vm0, %v6_v3  }
   0xe   :  { %17 = vrot.lane.b32.xlu0 %v16_v4, %s38_s9 }
  0x7c   :  { %v12_v5 = vpop.permute.xlu0 %11   ;;  %v24_v6 = vpop.permute.xlu1 %23  }
  0x7d   :  { %14 = vst.msk [vmem:[#allocation0] sm:$0x1] %vm13_vm1, %v12_v5  }
  0x80   :  { %v18_v7 = vpop.permute.xlu0 %17  }
  0x81   :  { %20 = vst.msk [vmem:[#allocation0] sm:$0x1] %vm19_vm2, %v18_v7  }
  0x82   :  { %26 = vst.msk [vmem:[#allocation0] sm:$0x1] %vm25_vm3, %v24_v6  }
  0x89   :  { %v30_v8 = vld [vmem:[#allocation0] sm:$0x1] }
  0x8a   :  { %32 = vst [vmem:[%s56_s1] sm:$0x1] %v30_v8 }

// kernel: _forward_impl.7
= control target key start
LH: loop header
LB: loop body
LE: loop exit
PB: predicated region body
PF: predicated region fallthrough
CT: control target
= control target key end

     0   :  { %s700_s18 = smov 0   ;;  %s773_s0 = inlined_call_operand.vmem [shape: f32[256,64], index: 0, kind: input, shape index: {}]   ;;  %s774_s1 = inlined_call_operand.vmem [shape: f32[1,64], index: 1, kind: input, shape index: {}]   ;;  %s775_s2 = inlined_call_operand.vmem [shape: f32[1,64], index: 2, kind: input, shape index: {}]   ;;  %s776_s3 = inlined_call_operand.vmem [shape: f32[64,8], index: 3, kind: input, shape index: {}]   ;;  %s777_s4 = inlined_call_operand.vmem [shape: f32[1,8], index: 4, kind: input, shape index: {}]   ;;  %s778_s5 = inlined_call_operand.vmem [shape: f32[256,8], index: 5, kind: output, shape index: {}]  }
   0x1 LB: > { %s532_s19 = sadd.s32 4294967295, %s668_s18   ;;  %p536_p0 = scmp.ge.s32.totalorder %s668_s18, 1  ;;  %s668_s18 = sphi %s700_s18, %s15_s18  }
   0x2   : > { %p188_p1 = scmp.lt.s32.totalorder %s668_s18, 5 }
   0x4   : > { %p189_p2 = pnand %p536_p0, %p188_p1 }
   0x5   : > { %v274_v0 = vld [vmem:[%s776_s3] sm:$0xff] (!%p189_p2)  ;;  %v275_v1 = vld [vmem:[%s776_s3 + $0x8] sm:$0xff] (!%p189_p2)  ;;  %v276_v2 = vld [vmem:[%s776_s3 + $0x10] sm:$0xff] (!%p189_p2)  ;;  %s537_s26 = sshll.u32 (!%p189_p2), %s532_s19, 3  ;;  %vm289_vm0 = vcmask (!%p189_p2), 523264   ;;  %vm467_vm1 = vcmask (!%p189_p2), 64512  }
   0x6   : > { %192 = sbr.rel (%p189_p2) target bundleno = 274 (0x112), region = 40  ;;  %v598_v3 = vpack.c.bf16 (!%p189_p2), %v275_v1, %v274_v0  ;;  %v277_v4 = vld [vmem:[%s776_s3 + $0x18] sm:$0xff] (!%p189_p2)  ;;  %p217_p3 = scmp.lt.s32.totalorder (!%p189_p2), %s537_s26, 31  ;;  %v278_v6 = vld [vmem:[%s776_s3 + $0x20] sm:$0xff] (!%p189_p2)  ;;  %v279_v7 = vld [vmem:[%s776_s3 + $0x28] sm:$0xff] (!%p189_p2) }
   0x7   : > { %v602_v5 = vpack.c.bf16 (!%p189_p2), %v277_v4, %v276_v2  ;;  %v280_v8 = vld [vmem:[%s776_s3 + $0x30] sm:$0xff] (!%p189_p2)  ;;  %v281_v9 = vld [vmem:[%s776_s3 + $0x38] sm:$0xff] (!%p189_p2)  ;;  %v606_v10 = vpack.c.bf16 (!%p189_p2), %v279_v7, %v278_v6  ;;  %v541_v11 = vld [vmem:[%s774_s1] ss:$0 sm:$0xff] (!%p189_p2) }
   0x8   : > { %599 = vmatprep.subr.bf16.mxu0 (!%p189_p2), %v598_v3  ;;  %614 = vmatprep.subr.bf16.mxu1 (!%p189_p2), %v598_v3  ;;  %v542_v12 = vld [vmem:[%s775_s2] ss:$0 sm:$0xff] (!%p189_p2)  ;;  %v610_v13 = vpack.c.bf16 (!%p189_p2), %v281_v9, %v280_v8 }
   0x9   : > { %601 = vmatpush3.bf16.msra.mxu0 (!%p189_p2), %v598_v3  ;;  %618 = vmatpush3.bf16.msra.mxu1 (!%p189_p2), %v598_v3  ;;  %v543_v46 = vld [vmem:[%s777_s4] ss:$0 sm:$0xff] (!%p189_p2) }
   0xa   : > { %603 = vmatprep.subr.bf16.mxu0 (!%p189_p2), %v602_v5  ;;  %615 = vmatprep.subr.bf16.mxu1 (!%p189_p2), %v602_v5 }
   0xd   : > { %s780_s26 = smov (!%p217_p3, %s537_s26), 31  ;;  %605 = vmatpush3.bf16.msra.mxu0 %v602_v5  ;;  %619 = vmatpush3.bf16.msra.mxu1 %v602_v5 }
   0xe   : > { %s538_s12 = sshll.u32 %s780_s26, 3  ;;  %607 = vmatprep.subr.bf16.mxu0 %v606_v10  ;;  %616 = vmatprep.subr.bf16.mxu1 %v606_v10 }
   0xf   : > { %s220_s17 = scalar_lea.vmem %s773_s0, %s538_s12  ;;  %s226_s25 = scalar_lea.vmem %s778_s5, %s538_s12 }
  0x10   : > { %v228_v14 = vld [vmem:[%s220_s17] sm:$0xff]  ;;  %v229_v16 = vld [vmem:[%s220_s17 + $0x8] sm:$0xff]  ;;  %v230_v21 = vld [vmem:[%s220_s17 + $0x10] sm:$0xff] }
  0x11   : > { %v232_v15 = vld [vmem:[%s220_s17 + $0x20] sm:$0xff]  ;;  %v243_v17 = vmul.f32 %v541_v11, %v228_v14  ;;  %v244_v19 = vmul.f32 %v541_v11, %v229_v16  ;;  %v233_v20 = vld [vmem:[%s220_s17 + $0x28] sm:$0xff]  ;;  %v234_v22 = vld [vmem:[%s220_s17 + $0x30] sm:$0xff]  ;;  %v245_v24 = vmul.f32 %v541_v11, %v230_v21  ;;  %609 = vmatpush3.bf16.msra.mxu0 %v606_v10  ;;  %620 = vmatpush3.bf16.msra.mxu1 %v606_v10 }
  0x12   : > { %v247_v18 = vmul.f32 %v541_v11, %v232_v15  ;;  %v248_v23 = vmul.f32 %v541_v11, %v233_v20  ;;  %v249_v25 = vmul.f32 %v541_v11, %v234_v22  ;;  %v231_v26 = vld [vmem:[%s220_s17 + $0x18] sm:$0xff]  ;;  %611 = vmatprep.subr.bf16.mxu0 %v610_v13  ;;  %617 = vmatprep.subr.bf16.mxu1 %v610_v13 }
  0x13   : > { %v235_v27 = vld [vmem:[%s220_s17 + $0x38] sm:$0xff]  ;;  %v258_v28 = vadd.f32 %v542_v12, %v243_v17  ;;  %v259_v30 = vadd.f32 %v542_v12, %v244_v19  ;;  %v246_v32 = vmul.f32 %v541_v11, %v231_v26  ;;  %v260_v36 = vadd.f32 %v542_v12, %v245_v24 }
  0x14   : > { %v262_v29 = vadd.f32 %v542_v12, %v247_v18  ;;  %v263_v31 = vadd.f32 %v542_v12, %v248_v23  ;;  %v250_v33 = vmul.f32 %v541_v11, %v235_v27  ;;  %v264_v37 = vadd.f32 %v542_v12, %v249_v25 }
  0x15   : > { %v266_v34 = vmax.f32 %v258_v28, 0.0  ;;  %v267_v38 = vmax.f32 %v259_v30, 0.0  ;;  %v261_v40 = vadd.f32 %v542_v12, %v246_v32  ;;  %613 = vmatpush3.bf16.msra.mxu0 %v610_v13  ;;  %621 = vmatpush3.bf16.msra.mxu1 %v610_v13  ;;  %v268_v42 = vmax.f32 %v260_v36, 0.0 }
  0x16   : > { %v270_v35 = vmax.f32 %v262_v29, 0.0  ;;  %v271_v39 = vmax.f32 %v263_v31, 0.0  ;;  %v265_v41 = vadd.f32 %v542_v12, %v250_v33  ;;  %v272_v43 = vmax.f32 %v264_v37, 0.0 }
  0x17   : > { %586 = vmatprep.mubr.msk.f32.mxu0 %vm289_vm0, %v266_v34  ;;  %v269_v44 = vmax.f32 %v261_v40, 0.0 }
  0x18   : > { %592 = vmatprep.mubr.msk.f32.mxu1 %vm289_vm0, %v270_v35  ;;  %587 = vmatmul.mubr.msk.f32.vlgmr.msra.gmra.mrb[0].mxu0 %vm289_vm0, %v267_v38  ;;  %v273_v45 = vmax.f32 %v265_v41, 0.0 }
  0x19   : > { %593 = vmatmul.mubr.msk.f32.vlgmr.msra.gmra.mrb[0].mxu1 %vm289_vm0, %v271_v39  ;;  %589 = vmatprep.mubr.msk.f32.mxu0 %vm289_vm0, %v268_v42 }
  0x1a   : > { %595 = vmatprep.mubr.msk.f32.mxu1 %vm289_vm0, %v272_v43 }
  0x1c   : > { %590 = vmatmul.mubr.msk.f32.gmra.mrb[2].mxu0 %vm289_vm0, %v269_v44 }
  0x1d   : > { %596 = vmatmul.mubr.msk.f32.gmra.mrb[2].mxu1 %vm289_vm0, %v273_v45 }
  0xeb   : > { %v588_v47 = vpop.f32.mrb[0].mxu0 }
  0xec   : > { %v594_v48 = vpop.f32.mrb[0].mxu1  ;;  %v386_v49 = vadd.f32 %v588_v47, %v543_v46  ;;  %v380_v51 = vpop.f32.mrb[1].mxu0 }
  0xed   : > { %v406_v50 = vadd.f32 %v594_v48, %v543_v46  ;;  %v400_v52 = vpop.f32.mrb[1].mxu1  ;;  %v381_v53 = vadd.f32 %v543_v46, %v380_v51 }
  0xee   : > { %v401_v54 = vadd.f32 %v543_v46, %v400_v52  ;;  %v420_v55 = vsub.f32 0.0, %v386_v49 }
  0xef   : > { %v424_v56 = vsub.f32 0.0, %v406_v50  ;;  %v419_v57 = vsub.f32 0.0, %v381_v53  ;;  %v591_v59 = vpop.f32.mrb[2].mxu0 }
  0xf0   : > { %v423_v58 = vsub.f32 0.0, %v401_v54  ;;  %v597_v60 = vpop.f32.mrb[2].mxu1  ;;  %v429_v61 = vmul.f32 1.442695, %v420_v55  ;;  %v396_v63 = vadd.f32 %v591_v59, %v543_v46  ;;  %v390_v1 = vpop.f32.mrb[3].mxu0 }
  0xf1   : > { %v437_v62 = vmul.f32 1.442695, %v424_v56  ;;  %v416_v0 = vadd.f32 %v597_v60, %v543_v46  ;;  %v410_v2 = vpop.f32.mrb[3].mxu1  ;;  %v427_v3 = vmul.f32 1.442695, %v419_v57  ;;  %v391_v5 = vadd.f32 %v543_v46, %v390_v1 }
  0xf2   : > { %v435_v4 = vmul.f32 1.442695, %v423_v58  ;;  %v411_v6 = vadd.f32 %v543_v46, %v410_v2  ;;  %630 = vpow2.f32 %v429_v61  ;;  %v422_v7 = vsub.f32 0.0, %v396_v63 }
  0xf3   : > { %v426_v8 = vsub.f32 0.0, %v416_v0  ;;  %632 = vpow2.f32 %v437_v62  ;;  %v421_v9 = vsub.f32 0.0, %v391_v5 }
  0xf4   : > { %v425_v10 = vsub.f32 0.0, %v411_v6  ;;  %634 = vpow2.f32 %v427_v3  ;;  %v433_v11 = vmul.f32 1.442695, %v422_v7 }
  0xf5   : > { %v441_v12 = vmul.f32 1.442695, %v426_v8  ;;  %636 = vpow2.f32 %v435_v4  ;;  %v431_v13 = vmul.f32 1.442695, %v421_v9 }
  0xf6   : > { %v439_v14 = vmul.f32 1.442695, %v425_v10  ;;  %638 = vpow2.f32 %v433_v11 }
  0xf7   : > { %640 = vpow2.f32 %v441_v12 }
  0xf8   : > { %642 = vpow2.f32 %v431_v13 }
  0xf9   : > { %644 = vpow2.f32 %v439_v14 }
  0xfc   : > { %v631_v15 = vpop.eup %630 }
  0xfd   : > { %v633_v16 = vpop.eup %632  ;;  %v444_v17 = vadd.f32 1.0, %v631_v15 }
  0xfe   : > { %v635_v18 = vpop.eup %634  ;;  %v448_v19 = vadd.f32 1.0, %v633_v16 }
  0xff   : > { %v637_v20 = vpop.eup %636  ;;  %646 = vrcp.f32 %v444_v17  ;;  %v443_v21 = vadd.f32 1.0, %v635_v18 }
 0x100   : > { %v639_v22 = vpop.eup %638  ;;  %648 = vrcp.f32 %v448_v19  ;;  %v447_v23 = vadd.f32 1.0, %v637_v20 }
 0x101   : > { %v641_v24 = vpop.eup %640  ;;  %650 = vrcp.f32 %v443_v21  ;;  %v446_v25 = vadd.f32 1.0, %v639_v22 }
 0x102   : > { %v643_v26 = vpop.eup %642  ;;  %652 = vrcp.f32 %v447_v23  ;;  %v450_v27 = vadd.f32 1.0, %v641_v24 }
 0x103   : > { %v645_v28 = vpop.eup %644  ;;  %654 = vrcp.f32 %v446_v25  ;;  %v445_v29 = vadd.f32 1.0, %v643_v26 }
 0x104   : > { %656 = vrcp.f32 %v450_v27  ;;  %v449_v30 = vadd.f32 1.0, %v645_v28 }
 0x105   : > { %658 = vrcp.f32 %v445_v29 }
 0x106   : > { %660 = vrcp.f32 %v449_v30 }
 0x109   : > { %v647_v31 = vpop.eup %646 }
 0x10a   : > { %v649_v32 = vpop.eup %648  ;;  %469 = vst.msk [vmem:[%s226_s25 + $0x8] sm:$0xff] %vm467_vm1, %v647_v31 }
 0x10b   : > { %v651_v33 = vpop.eup %650  ;;  %473 = vst.msk [vmem:[%s226_s25 + $0x28] sm:$0xff] %vm467_vm1, %v649_v32 }
 0x10c   : > { %v653_v34 = vpop.eup %652  ;;  %468 = vst.msk [vmem:[%s226_s25] sm:$0xff] %vm467_vm1, %v651_v33 }
 0x10d   : > { %v655_v35 = vpop.eup %654  ;;  %472 = vst.msk [vmem:[%s226_s25 + $0x20] sm:$0xff] %vm467_vm1, %v653_v34 }
 0x10e   : > { %v657_v36 = vpop.eup %656  ;;  %471 = vst.msk [vmem:[%s226_s25 + $0x18] sm:$0xff] %vm467_vm1, %v655_v35 }
 0x10f   : > { %v659_v37 = vpop.eup %658  ;;  %475 = vst.msk [vmem:[%s226_s25 + $0x38] sm:$0xff] %vm467_vm1, %v657_v36 }
 0x110   : > { %v661_v38 = vpop.eup %660  ;;  %470 = vst.msk [vmem:[%s226_s25 + $0x10] sm:$0xff] %vm467_vm1, %v659_v37 }
 0x111   : > { %474 = vst.msk [vmem:[%s226_s25 + $0x30] sm:$0xff] %vm467_vm1, %v661_v38 }
 0x112 PF: > { %s15_s18 = sadd.s32 1, %s668_s18  }
 0x113   : > { %p12_p4 = scmp.ge.s32.totalorder %s15_s18, 6  }
 0x115   :  { %14 = sbr.rel (!%p12_p4) target bundleno = 1 (0x1), region = 70 }

</bundles_post_ra>
